<compile_context>
chip_gen: v5e
topology: v5e:2x2
jax: 0.10.0
libtpu: 0.0.40
codegen_flags: <defaults>
</compile_context>

<pallas_src>
import jax
import jax.numpy as jnp
from jax.experimental import pallas as pl
from jax.experimental.pallas import tpu as pltpu

N_DIMS_DATA = 784
N_DIMS_CODE = 2
HIDDEN = 32
MU_PAD = 128          # lane-dense padding for the mu output
DEFAULT_TILE_N = 1024  # rows per grid step (fits default scoped VMEM on v5e/v6e/v7x)


def _round_up(n, m):
    return (n + m - 1) // m * m


def vae_forward_kernel(x_ref,
                       w1_ref, b1_ref,     # encoder 0: 784 -> 32, ReLU   (bf16 / f32)
                       w2p_ref, b2p_ref,   # encoder 1: 32 -> 128 (mu, lane-padded)
                       w23_ref, b23_ref,   # fused decoder 0: 32 -> 32, ReLU (eval: z=mu)
                       w4_ref, b4_ref,     # decoder 1: 32 -> 784, sigmoid
                       xproba_ref, mu_ref):
    x = x_ref[...]                                                    # bf16 [T, 784]

    # ---- encoder layer 0: ReLU(x @ W1 + b1) ----
    h1 = jnp.dot(x, w1_ref[...], preferred_element_type=jnp.float32) + b1_ref[...]
    h1 = jnp.maximum(h1, 0.0)                                         # f32 [T, 32]
    h1b = h1.astype(jnp.bfloat16)

    # ---- encoder layer 1 (mu), lane-padded to 128 for a dense store ----
    mu_ref[...] = (jnp.dot(h1b, w2p_ref[...], preferred_element_type=jnp.float32)
                   + b2p_ref[...])                                    # f32 [T, 128]

    # ---- decoder layer 0 with the 2-wide bottleneck folded away ----
    # relu(mu @ w3 + b3) == relu(h1 @ (w2 @ w3) + (b2 @ w3 + b3))  (z = mu, eval mode)
    h2 = jnp.dot(h1b, w23_ref[...], preferred_element_type=jnp.float32) + b23_ref[...]
    h2 = jnp.maximum(h2, 0.0)                                         # f32 [T, 32]
    h2b = h2.astype(jnp.bfloat16)

    # ---- decoder layer 1 + sigmoid (math in f32, store bf16) ----
    logits = jnp.dot(h2b, w4_ref[...], preferred_element_type=jnp.float32) + b4_ref[...]
    xproba_ref[...] = jax.nn.sigmoid(logits).astype(xproba_ref.dtype)


def vae_forward(x, params, *, tile_n=DEFAULT_TILE_N):
    """x: [N, 784] float32.  params: dict of pre-transposed f32 weights/biases.

    Returns (xproba_ND [N,784] bfloat16, mu_NC [N,2] float32).
    xproba is intentionally bf16 (HBM-bandwidth optimization); cast if f32 needed.
    """
    N, D = x.shape
    assert D == N_DIMS_DATA

    # --- wrapper-side param prep (tiny, done once per call / jit-constant-folded) ---
    # Fold the 2-wide bottleneck (valid because z = mu in eval mode).
    w23 = params["w2"] @ params["w3"]                      # [32, 32]
    b23 = params["b2"] @ params["w3"] + params["b3"]       # [1, 32]
    # Zero-pad the mu projection to 128 output lanes for dense stores.
    w2p = jnp.zeros((HIDDEN, MU_PAD), jnp.float32).at[:, :N_DIMS_CODE].set(params["w2"])
    b2p = jnp.zeros((1, MU_PAD), jnp.float32).at[:, :N_DIMS_CODE].set(params["b2"])

    # bf16 for the bandwidth-dominant arrays; biases stay f32 (added post-accumulate).
    xb = x.astype(jnp.bfloat16)
    w1 = params["w1"].astype(jnp.bfloat16)
    w4 = params["w4"].astype(jnp.bfloat16)
    w2p = w2p.astype(jnp.bfloat16)
    w23 = w23.astype(jnp.bfloat16)
    b1, b4 = params["b1"], params["b4"]

    # --- batch tiling (pad N up to a multiple of the tile, slice back after) ---
    tile_n = int(min(tile_n, _round_up(N, 8)))
    tile_n = _round_up(tile_n, 8)
    n_pad = _round_up(N, tile_n)
    if n_pad != N:
        xb = jnp.pad(xb, ((0, n_pad - N), (0, 0)))
    grid = (n_pad // tile_n,)

    def row_spec(cols):
        return pl.BlockSpec((tile_n, cols), lambda i: (i, 0))

    def resident(a):  # full-array block, constant index -> stays in VMEM across steps
        return pl.BlockSpec(a.shape, lambda i: (0, 0))

    xproba, mu = pl.pallas_call(
        vae_forward_kernel,
        out_shape=(jax.ShapeDtypeStruct((n_pad, D), jnp.bfloat16),
                   jax.ShapeDtypeStruct((n_pad, MU_PAD), jnp.float32)),
        grid=grid,
        in_specs=[row_spec(D),
                  resident(w1), resident(b1),
                  resident(w2p), resident(b2p),
                  resident(w23), resident(b23),
                  resident(w4), resident(b4)],
        out_specs=(row_spec(D),
                   pl.BlockSpec((tile_n, MU_PAD), lambda i: (i, 0))),
        compiler_params=pltpu.CompilerParams(
            dimension_semantics=("parallel",)),
    )(xb, w1, b1, w2p, b2p, w23, b23, w4, b4)

    return xproba[:N], mu[:N, :N_DIMS_CODE]


def init_params(key):
    """Deterministic init mimicking torch.nn.Linear (uniform +-1/sqrt(fan_in)).
    Weights stored as [in, out] (already transposed for x @ W)."""
    sizes = [(N_DIMS_DATA, HIDDEN), (HIDDEN, N_DIMS_CODE),     # encoder
             (N_DIMS_CODE, HIDDEN), (HIDDEN, N_DIMS_DATA)]     # decoder
    params = {}
    for idx, (n_in, n_out) in enumerate(sizes, start=1):
        key, kw, kb = jax.random.split(key, 3)
        bound = 1.0 / jnp.sqrt(jnp.float32(n_in))
        params[f"w{idx}"] = jax.random.uniform(
            kw, (n_in, n_out), jnp.float32, -bound, bound)
        params[f"b{idx}"] = jax.random.uniform(
            kb, (1, n_out), jnp.float32, -bound, bound)
    return params


def vae_forward_ref(x, p):
    """Pure-JAX f32 reference reproducing the PyTorch eval-mode forward()."""
    h1 = jnp.maximum(x @ p["w1"] + p["b1"], 0.0)
    mu = h1 @ p["w2"] + p["b2"]
    h2 = jnp.maximum(mu @ p["w3"] + p["b3"], 0.0)
    xproba = jax.nn.sigmoid(h2 @ p["w4"] + p["b4"])
    return xproba, mu


if __name__ == "__main__":
    key = jax.random.PRNGKey(0)
    key, kx1, kx2, kp = jax.random.split(key, 4)
    params = init_params(kp)

    # Note: at tiny batches the kernel is pure launch/DMA-setup overhead; the
    # tiling/bf16 wins assume production batch sizes.

    # Test 1: tiny batch, single tile.
    N1 = 8
    x1 = jax.random.uniform(kx1, (N1, N_DIMS_DATA), jnp.float32)
    xp1, mu1 = vae_forward(x1, params)
    jax.block_until_ready((xp1, mu1))

    # Test 2: non-multiple batch with multiple grid steps (exercises tiling + padding).
    N2 = 300
    x2 = jax.random.uniform(kx2, (N2, N_DIMS_DATA), jnp.float32)
    xp2, mu2 = vae_forward(x2, params, tile_n=128)
    jax.block_until_ready((xp2, mu2))

    # Correctness vs f32 reference (tolerance loosened for bf16 I/O).
    for (xp, mu, x, n) in ((xp1, mu1, x1, N1), (xp2, mu2, x2, N2)):
        xp_ref, mu_ref = vae_forward_ref(x, params)
        assert xp.shape == (n, N_DIMS_DATA) and mu.shape == (n, N_DIMS_CODE)
        assert jnp.allclose(xp.astype(jnp.float32), xp_ref, atol=3e-2, rtol=3e-2)
        assert jnp.allclose(mu, mu_ref, atol=3e-2, rtol=3e-2)

    print("KERNEL_OK")
</pallas_src>

<mosaic_0001>
module attributes {stable_mosaic.version = 11 : i64} {
  func.func @vae_forward_kernel(%arg0: i32, %arg1: memref<8x784xbf16, #tpu.memory_space<vmem>>, %arg2: memref<784x32xbf16, #tpu.memory_space<vmem>>, %arg3: memref<1x32xf32, #tpu.memory_space<vmem>>, %arg4: memref<32x128xbf16, #tpu.memory_space<vmem>>, %arg5: memref<1x128xf32, #tpu.memory_space<vmem>>, %arg6: memref<32x32xbf16, #tpu.memory_space<vmem>>, %arg7: memref<1x32xf32, #tpu.memory_space<vmem>>, %arg8: memref<32x784xbf16, #tpu.memory_space<vmem>>, %arg9: memref<1x784xf32, #tpu.memory_space<vmem>>, %arg10: memref<8x784xbf16, #tpu.memory_space<vmem>>, %arg11: memref<8x128xf32, #tpu.memory_space<vmem>>) attributes {dimension_semantics = [#tpu.dimension_semantics<parallel>], iteration_bounds = array<i64: 1>, scalar_prefetch = 0 : i64, scratch_operands = 0 : i64, tpu.core_type = #tpu.core_type<tc>, window_params = [{transform_indices = @transform_0, window_bounds = array<i64: 8, 784>}, {pipeline_mode = #tpu.pipeline_mode<synchronous>, transform_indices = @transform_1, window_bounds = array<i64: 784, 32>}, {pipeline_mode = #tpu.pipeline_mode<synchronous>, transform_indices = @transform_2, window_bounds = array<i64: 1, 32>}, {pipeline_mode = #tpu.pipeline_mode<synchronous>, transform_indices = @transform_3, window_bounds = array<i64: 32, 128>}, {pipeline_mode = #tpu.pipeline_mode<synchronous>, transform_indices = @transform_4, window_bounds = array<i64: 1, 128>}, {pipeline_mode = #tpu.pipeline_mode<synchronous>, transform_indices = @transform_5, window_bounds = array<i64: 32, 32>}, {pipeline_mode = #tpu.pipeline_mode<synchronous>, transform_indices = @transform_6, window_bounds = array<i64: 1, 32>}, {pipeline_mode = #tpu.pipeline_mode<synchronous>, transform_indices = @transform_7, window_bounds = array<i64: 32, 784>}, {pipeline_mode = #tpu.pipeline_mode<synchronous>, transform_indices = @transform_8, window_bounds = array<i64: 1, 784>}, {transform_indices = @transform_9, window_bounds = array<i64: 8, 784>}, {transform_indices = @transform_10, window_bounds = array<i64: 8, 128>}]} {
    %c0 = arith.constant 0 : index
    %c0_0 = arith.constant 0 : index
    %0 = vector.load %arg1[%c0, %c0_0] : memref<8x784xbf16, #tpu.memory_space<vmem>>, vector<8x784xbf16>
    %c0_1 = arith.constant 0 : index
    %c0_2 = arith.constant 0 : index
    %1 = vector.load %arg2[%c0_1, %c0_2] : memref<784x32xbf16, #tpu.memory_space<vmem>>, vector<784x32xbf16>
    %cst = arith.constant dense<0.000000e+00> : vector<8x32xf32>
    %2 = tpu.matmul %0, %1, %cst {dimension_numbers = #tpu.dot_dimension_numbers<[1], [0], [0], [1], [0, 0, 1, 1], [], []>} : vector<8x784xbf16>, vector<784x32xbf16>, vector<8x32xf32> -> vector<8x32xf32>
    %c0_3 = arith.constant 0 : index
    %c0_4 = arith.constant 0 : index
    %3 = vector.load %arg3[%c0_3, %c0_4] : memref<1x32xf32, #tpu.memory_space<vmem>>, vector<1x32xf32>
    %4 = vector.broadcast %3 : vector<1x32xf32> to vector<8x32xf32>
    %5 = arith.addf %2, %4 : vector<8x32xf32>
    %cst_5 = arith.constant 0.000000e+00 : f32
    %6 = vector.broadcast %cst_5 : f32 to vector<8x32xf32>
    %7 = arith.maximumf %5, %6 : vector<8x32xf32>
    %8 = arith.truncf %7 : vector<8x32xf32> to vector<8x32xbf16>
    %c0_6 = arith.constant 0 : index
    %c0_7 = arith.constant 0 : index
    %9 = vector.load %arg4[%c0_6, %c0_7] : memref<32x128xbf16, #tpu.memory_space<vmem>>, vector<32x128xbf16>
    %cst_8 = arith.constant dense<0.000000e+00> : vector<8x128xf32>
    %10 = tpu.matmul %8, %9, %cst_8 {dimension_numbers = #tpu.dot_dimension_numbers<[1], [0], [0], [1], [0, 0, 1, 1], [], []>} : vector<8x32xbf16>, vector<32x128xbf16>, vector<8x128xf32> -> vector<8x128xf32>
    %c0_9 = arith.constant 0 : index
    %c0_10 = arith.constant 0 : index
    %11 = vector.load %arg5[%c0_9, %c0_10] : memref<1x128xf32, #tpu.memory_space<vmem>>, vector<1x128xf32>
    %12 = vector.broadcast %11 : vector<1x128xf32> to vector<8x128xf32>
    %13 = arith.addf %10, %12 : vector<8x128xf32>
    %c0_11 = arith.constant 0 : index
    %c0_12 = arith.constant 0 : index
    %14 = vector.load %arg11[%c0_11, %c0_12] : memref<8x128xf32, #tpu.memory_space<vmem>>, vector<8x128xf32>
    tpu.vector_store %arg11[%c0_11, %c0_12], %13 {strides = array<i32>} : memref<8x128xf32, #tpu.memory_space<vmem>>, vector<8x128xf32>,
    %c0_13 = arith.constant 0 : index
    %c0_14 = arith.constant 0 : index
    %15 = vector.load %arg6[%c0_13, %c0_14] : memref<32x32xbf16, #tpu.memory_space<vmem>>, vector<32x32xbf16>
    %cst_15 = arith.constant dense<0.000000e+00> : vector<8x32xf32>
    %16 = tpu.matmul %8, %15, %cst_15 {dimension_numbers = #tpu.dot_dimension_numbers<[1], [0], [0], [1], [0, 0, 1, 1], [], []>} : vector<8x32xbf16>, vector<32x32xbf16>, vector<8x32xf32> -> vector<8x32xf32>
    %c0_16 = arith.constant 0 : index
    %c0_17 = arith.constant 0 : index
    %17 = vector.load %arg7[%c0_16, %c0_17] : memref<1x32xf32, #tpu.memory_space<vmem>>, vector<1x32xf32>
    %18 = vector.broadcast %17 : vector<1x32xf32> to vector<8x32xf32>
    %19 = arith.addf %16, %18 : vector<8x32xf32>
    %cst_18 = arith.constant 0.000000e+00 : f32
    %20 = vector.broadcast %cst_18 : f32 to vector<8x32xf32>
    %21 = arith.maximumf %19, %20 : vector<8x32xf32>
    %22 = arith.truncf %21 : vector<8x32xf32> to vector<8x32xbf16>
    %c0_19 = arith.constant 0 : index
    %c0_20 = arith.constant 0 : index
    %23 = vector.load %arg8[%c0_19, %c0_20] : memref<32x784xbf16, #tpu.memory_space<vmem>>, vector<32x784xbf16>
    %cst_21 = arith.constant dense<0.000000e+00> : vector<8x784xf32>
    %24 = tpu.matmul %22, %23, %cst_21 {dimension_numbers = #tpu.dot_dimension_numbers<[1], [0], [0], [1], [0, 0, 1, 1], [], []>} : vector<8x32xbf16>, vector<32x784xbf16>, vector<8x784xf32> -> vector<8x784xf32>
    %c0_22 = arith.constant 0 : index
    %c0_23 = arith.constant 0 : index
    %25 = vector.load %arg9[%c0_22, %c0_23] : memref<1x784xf32, #tpu.memory_space<vmem>>, vector<1x784xf32>
    %26 = vector.broadcast %25 : vector<1x784xf32> to vector<8x784xf32>
    %27 = arith.addf %24, %26 : vector<8x784xf32>
    %28 = arith.negf %27 : vector<8x784xf32>
    %29 = math.exp %28 : vector<8x784xf32>
    %cst_24 = arith.constant 1.000000e+00 : f32
    %30 = vector.broadcast %cst_24 : f32 to vector<8x784xf32>
    %31 = arith.addf %30, %29 : vector<8x784xf32>
    %32 = arith.divf %30, %31 : vector<8x784xf32>
    %33 = arith.truncf %32 : vector<8x784xf32> to vector<8x784xbf16>
    %c0_25 = arith.constant 0 : index
    %c0_26 = arith.constant 0 : index
    %34 = vector.load %arg10[%c0_25, %c0_26] : memref<8x784xbf16, #tpu.memory_space<vmem>>, vector<8x784xbf16>
    tpu.vector_store %arg10[%c0_25, %c0_26], %33 {strides = array<i32>} : memref<8x784xbf16, #tpu.memory_space<vmem>>, vector<8x784xbf16>,
    return
  }
  func.func @transform_0(%arg0: i32) -> (i32, i32) {
    %c0_i32 = arith.constant 0 : i32
    %c0_i32_0 = arith.constant 0 : i32
    return %arg0, %c0_i32 : i32, i32
  }
  func.func @transform_1(%arg0: i32) -> (i32, i32) {
    %c0_i32 = arith.constant 0 : i32
    %c0_i32_0 = arith.constant 0 : i32
    %c0_i32_1 = arith.constant 0 : i32
    return %c0_i32, %c0_i32_0 : i32, i32
  }
  func.func @transform_2(%arg0: i32) -> (i32, i32) {
    %c0_i32 = arith.constant 0 : i32
    %c0_i32_0 = arith.constant 0 : i32
    %c0_i32_1 = arith.constant 0 : i32
    return %c0_i32, %c0_i32_0 : i32, i32
  }
  func.func @transform_3(%arg0: i32) -> (i32, i32) {
    %c0_i32 = arith.constant 0 : i32
    %c0_i32_0 = arith.constant 0 : i32
    %c0_i32_1 = arith.constant 0 : i32
    return %c0_i32, %c0_i32_0 : i32, i32
  }
  func.func @transform_4(%arg0: i32) -> (i32, i32) {
    %c0_i32 = arith.constant 0 : i32
    %c0_i32_0 = arith.constant 0 : i32
    %c0_i32_1 = arith.constant 0 : i32
    return %c0_i32, %c0_i32_0 : i32, i32
  }
  func.func @transform_5(%arg0: i32) -> (i32, i32) {
    %c0_i32 = arith.constant 0 : i32
    %c0_i32_0 = arith.constant 0 : i32
    %c0_i32_1 = arith.constant 0 : i32
    return %c0_i32, %c0_i32_0 : i32, i32
  }
  func.func @transform_6(%arg0: i32) -> (i32, i32) {
    %c0_i32 = arith.constant 0 : i32
    %c0_i32_0 = arith.constant 0 : i32
    %c0_i32_1 = arith.constant 0 : i32
    return %c0_i32, %c0_i32_0 : i32, i32
  }
  func.func @transform_7(%arg0: i32) -> (i32, i32) {
    %c0_i32 = arith.constant 0 : i32
    %c0_i32_0 = arith.constant 0 : i32
    %c0_i32_1 = arith.constant 0 : i32
    return %c0_i32, %c0_i32_0 : i32, i32
  }
  func.func @transform_8(%arg0: i32) -> (i32, i32) {
    %c0_i32 = arith.constant 0 : i32
    %c0_i32_0 = arith.constant 0 : i32
    %c0_i32_1 = arith.constant 0 : i32
    return %c0_i32, %c0_i32_0 : i32, i32
  }
  func.func @transform_9(%arg0: i32) -> (i32, i32) {
    %c0_i32 = arith.constant 0 : i32
    %c0_i32_0 = arith.constant 0 : i32
    return %arg0, %c0_i32 : i32, i32
  }
  func.func @transform_10(%arg0: i32) -> (i32, i32) {
    %c0_i32 = arith.constant 0 : i32
    %c0_i32_0 = arith.constant 0 : i32
    return %arg0, %c0_i32 : i32, i32
  }
}

</mosaic_0001>

<bundles_post_ra>
// kernel: tpu_custom_call.1
= control target key start
LH: loop header
LB: loop body
LE: loop exit
PB: predicated region body
PF: predicated region fallthrough
CT: control target
= control target key end

     0   :  { %16 = vsyncpa [#allocation3], 0  ;;  %s1882_s0 = inlined_call_operand.vmem [shape: bf16[8,784], index: 0, kind: input, shape index: {}]   ;;  %s1883_s1 = inlined_call_operand.vmem [shape: bf16[784,32], index: 1, kind: input, shape index: {}]   ;;  %s1884_s2 = inlined_call_operand.vmem [shape: f32[1,32], index: 2, kind: input, shape index: {}]   ;;  %s1885_s3 = inlined_call_operand.vmem [shape: bf16[32,128], index: 3, kind: input, shape index: {}]   ;;  %s1886_s4 = inlined_call_operand.vmem [shape: f32[1,128], index: 4, kind: input, shape index: {}]   ;;  %s1887_s5 = inlined_call_operand.vmem [shape: bf16[32,32], index: 5, kind: input, shape index: {}]   ;;  %s1888_s6 = inlined_call_operand.vmem [shape: f32[1,32], index: 6, kind: input, shape index: {}]   ;;  %s1889_s7 = inlined_call_operand.vmem [shape: bf16[32,784], index: 7, kind: input, shape index: {}]   ;;  %s1890_s8 = inlined_call_operand.vmem [shape: f32[1,784], index: 8, kind: input, shape index: {}]   ;;  %s1891_s9 = inlined_call_operand.hbm [shape: bf16[8,784], index: 9, kind: output, shape index: {0}]   ;;  %s1892_s10 = inlined_call_operand.hbm [shape: f32[8,128], index: 10, kind: output, shape index: {1}]  }
   0x1   :  { %v1295_v0 = vld [vmem:[%s1883_s1 + $0x38] sm:$0xff]  ;;  %v1294_v3 = vld [vmem:[%s1883_s1 + $0x30] sm:$0xff]  ;;  %v1293_v8 = vld [vmem:[%s1883_s1 + $0x28] sm:$0xff] }
   0x2   :  { %v1303_v1 = vld [vmem:[%s1883_s1 + $0x78] sm:$0xff]  ;;  %465 = vmatpush.bf16.msra.mxu0 %v1295_v0  ;;  %v1302_v4 = vld [vmem:[%s1883_s1 + $0x70] sm:$0xff]  ;;  %v1301_v9 = vld [vmem:[%s1883_s1 + $0x68] sm:$0xff] }
   0x3   :  { %v1311_v2 = vld [vmem:[%s1883_s1 + $0xb8] sm:$0xff]  ;;  %478 = vmatpush.bf16.msra.mxu1 %v1303_v1  ;;  %v1310_v5 = vld [vmem:[%s1883_s1 + $0xb0] sm:$0xff]  ;;  %v1309_v10 = vld [vmem:[%s1883_s1 + $0xa8] sm:$0xff] }
   0x4   :  { %491 = vmatpush.bf16.msra.mxu2 %v1311_v2  ;;  %v1319_v6 = vld [vmem:[%s1883_s1 + $0xf8] sm:$0xff]  ;;  %v1318_v7 = vld [vmem:[%s1883_s1 + $0xf0] sm:$0xff]  ;;  %v1317_v11 = vld [vmem:[%s1883_s1 + $0xe8] sm:$0xff] }
   0x5   :  { %504 = vmatpush.bf16.msra.mxu3 %v1319_v6  ;;  %v1292_v12 = vld [vmem:[%s1883_s1 + $0x20] sm:$0xff]  ;;  %v1291_v16 = vld [vmem:[%s1883_s1 + $0x18] sm:$0xff] }
   0x6   :  { %466 = vmatpush.bf16.msra.mxu0 %v1294_v3  ;;  %v1300_v13 = vld [vmem:[%s1883_s1 + $0x60] sm:$0xff]  ;;  %v1299_v17 = vld [vmem:[%s1883_s1 + $0x58] sm:$0xff] }
   0x7   :  { %479 = vmatpush.bf16.msra.mxu1 %v1302_v4  ;;  %v1308_v14 = vld [vmem:[%s1883_s1 + $0xa0] sm:$0xff]  ;;  %v1307_v18 = vld [vmem:[%s1883_s1 + $0x98] sm:$0xff] }
   0x8   :  { %492 = vmatpush.bf16.msra.mxu2 %v1310_v5  ;;  %v1316_v15 = vld [vmem:[%s1883_s1 + $0xe0] sm:$0xff] }
   0x9   :  { %505 = vmatpush.bf16.msra.mxu3 %v1318_v7 }
   0xa   :  { %467 = vmatpush.bf16.msra.mxu0 %v1293_v8 }
   0xb   :  { %480 = vmatpush.bf16.msra.mxu1 %v1301_v9 }
   0xc   :  { %493 = vmatpush.bf16.msra.mxu2 %v1309_v10 }
   0xd   :  { %506 = vmatpush.bf16.msra.mxu3 %v1317_v11 }
   0xe   :  { %468 = vmatpush.bf16.msra.mxu0 %v1292_v12 }
   0xf   :  { %481 = vmatpush.bf16.msra.mxu1 %v1300_v13 }
  0x10   :  { %494 = vmatpush.bf16.msra.mxu2 %v1308_v14 }
  0x11   :  { %17 = vsyncpa [#allocation5], 0  ;;  %507 = vmatpush.bf16.msra.mxu3 %v1316_v15  ;;  %v1315_v19 = vld [vmem:[%s1883_s1 + $0xd8] sm:$0xff]  ;;  %v1290_v20 = vld [vmem:[%s1883_s1 + $0x10] sm:$0xff]  ;;  %vm461_vm0 = vcmask 130048   ;;  %vm578_vm1 = vcmask 261120  }
  0x12   :  { %469 = vmatpush.bf16.msra.mxu0 %v1291_v16  ;;  %v1298_v21 = vld [vmem:[%s1883_s1 + $0x50] sm:$0xff]  ;;  %v1289_v24 = vld [vmem:[%s1883_s1 + $0x8] sm:$0xff]  ;;  %v37_v26 = vld [vmem:[%s1882_s0] sm:$0xff]  ;;  %s989_s16 = sshll.u32 %s1892_s10, 4  ;;  %s990_s16 = int_to_ptr.hbm [resolvable:$true] %s989_s16 }
  0x13   :  { %482 = vmatpush.bf16.msra.mxu1 %v1299_v17  ;;  %v1306_v22 = vld [vmem:[%s1883_s1 + $0x90] sm:$0xff]  ;;  %v1297_v25 = vld [vmem:[%s1883_s1 + $0x48] sm:$0xff]  ;;  %v147_v29 = vunpack.c.l.b16 %v37_v26  ;;  %v148_v31 = vunpack.c.h.b16 %v37_v26  ;;  %v1288_v32 = vld [vmem:[%s1883_s1] sm:$0xff] }
  0x14   :  { %495 = vmatpush.bf16.msra.mxu2 %v1307_v18  ;;  %v1314_v23 = vld [vmem:[%s1883_s1 + $0xd0] sm:$0xff]  ;;  %v1305_v27 = vld [vmem:[%s1883_s1 + $0x88] sm:$0xff]  ;;  %v1296_v33 = vld [vmem:[%s1883_s1 + $0x40] sm:$0xff] }
  0x15   :  { %508 = vmatpush.bf16.msra.mxu3 %v1315_v19  ;;  %v38_v28 = vld [vmem:[%s1882_s0 + $0x8] sm:$0xff]  ;;  %v1327_v34 = vld [vmem:[%s1883_s1 + $0x138] sm:$0xff]  ;;  %v1304_v36 = vld [vmem:[%s1883_s1 + $0x80] sm:$0xff]  ;;  %v154_v38 = vpack.c.b16 %v147_v29, %v147_v29  ;;  %v155_v39 = vpack.c.b16 %v148_v31, %v148_v31 }
  0x16   :  { %470 = vmatpush.bf16.msra.mxu0 %v1290_v20  ;;  %v1313_v30 = vld [vmem:[%s1883_s1 + $0xc8] sm:$0xff]  ;;  %v1335_v35 = vld [vmem:[%s1883_s1 + $0x178] sm:$0xff]  ;;  %v149_v37 = vunpack.c.l.b16 %v38_v28  ;;  %v150_v40 = vunpack.c.h.b16 %v38_v28  ;;  %v1312_v41 = vld [vmem:[%s1883_s1 + $0xc0] sm:$0xff] }
  0x17   :  { %483 = vmatpush.bf16.msra.mxu1 %v1298_v21  ;;  %v1336_v42 = vld [vmem:[%s1883_s1 + $0x180] sm:$0xff]  ;;  %v1326_v43 = vld [vmem:[%s1883_s1 + $0x130] sm:$0xff]  ;;  %v1325_v47 = vld [vmem:[%s1883_s1 + $0x128] sm:$0xff] }
  0x18   :  { %496 = vmatpush.bf16.msra.mxu2 %v1306_v22  ;;  %v1334_v44 = vld [vmem:[%s1883_s1 + $0x170] sm:$0xff]  ;;  %v156_v45 = vpack.c.b16 %v149_v37, %v149_v37  ;;  %v157_v46 = vpack.c.b16 %v150_v40, %v150_v40  ;;  %v1333_v48 = vld [vmem:[%s1883_s1 + $0x168] sm:$0xff]  ;;  %v1324_v49 = vld [vmem:[%s1883_s1 + $0x120] sm:$0xff] }
  0x19   :  { %509 = vmatpush.bf16.msra.mxu3 %v1314_v23  ;;  %v1332_v50 = vld [vmem:[%s1883_s1 + $0x160] sm:$0xff]  ;;  %v40_v51 = vld [vmem:[%s1882_s0 + $0x18] sm:$0xf]  ;;  %v1322_v55 = vld [vmem:[%s1883_s1 + $0x110] sm:$0xff] }
  0x1a   :  { %471 = vmatpush.bf16.msra.mxu0 %v1289_v24  ;;  %v1323_v52 = vld [vmem:[%s1883_s1 + $0x118] sm:$0xff]  ;;  %v153_v54 = vunpack.c.l.b16 %v40_v51  ;;  %v1330_v56 = vld [vmem:[%s1883_s1 + $0x150] sm:$0xff]  ;;  %v1321_v58 = vld [vmem:[%s1883_s1 + $0x108] sm:$0xff] }
  0x1b   :  { %484 = vmatpush.bf16.msra.mxu1 %v1297_v25  ;;  %v1331_v53 = vld [vmem:[%s1883_s1 + $0x158] sm:$0xff]  ;;  %v1329_v59 = vld [vmem:[%s1883_s1 + $0x148] sm:$0xff]  ;;  %v39_v60 = vld [vmem:[%s1882_s0 + $0x10] sm:$0xff] }
  0x1c   :  { %497 = vmatpush.bf16.msra.mxu2 %v1305_v27  ;;  %v160_v57 = vpack.c.b16 %v153_v54, %v153_v54  ;;  %v151_v61 = vunpack.c.l.b16 %v39_v60  ;;  %v152_v62 = vunpack.c.h.b16 %v39_v60  ;;  %v1320_v63 = vld [vmem:[%s1883_s1 + $0x100] sm:$0xff]  ;;  %v1340_v3 = vld [vmem:[%s1887_s5 + $0x8] sm:$0xff]  ;;  %v1248_v11 = vld [vmem:[%s1889_s7 + $0x38] sm:$0xf] }
  0x1d   :  { %510 = vmatpush.bf16.msra.mxu3 %v1313_v30  ;;  %v1328_v0 = vld [vmem:[%s1883_s1 + $0x140] sm:$0xff]  ;;  %v1338_v4 = vld [vmem:[%s1885_s3 + $0x8] sm:$0xff]  ;;  %v1351_v12 = vld [vmem:[%s1889_s7 + $0x50] sm:$0xf0] }
  0x1e   :  { %472 = vmatpush.bf16.msra.mxu0 %v1288_v32  ;;  %v158_v1 = vpack.c.b16 %v151_v61, %v151_v61  ;;  %v159_v2 = vpack.c.b16 %v152_v62, %v152_v62  ;;  %v1339_v7 = vld [vmem:[%s1887_s5] sm:$0xff]  ;;  %v1348_v13 = vld [vmem:[%s1889_s7 + $0x3c] sm:$0xf]  ;;  %v1249_v15 = vor.u32 %v1351_v12, %v1248_v11  ;;  %v1250_v16 = vld [vmem:[%s1889_s7 + $0x54] sm:$0xf0] }
  0x1f   :  { %485 = vmatpush.bf16.msra.mxu1 %v1296_v33  ;;  %v1337_v8 = vld [vmem:[%s1885_s3] sm:$0xff]  ;;  %v1352_v18 = vld [vmem:[%s1889_s7 + $0x58] sm:$0xf0]  ;;  %v1253_v20 = vor.u32 %v1348_v13, %v1250_v16  ;;  %v1342_v51 = vld [vmem:[%s1889_s7 + $0xc] sm:$0xf] }
  0x20   :  { %498 = vmatpush.bf16.msra.mxu2 %v1304_v36  ;;  %v1256_v17 = vld [vmem:[%s1889_s7 + $0x40] sm:$0xf]  ;;  %v1344_v23 = vld [vmem:[%s1889_s7 + $0x18] sm:$0xf0]  ;;  %v1272_v60 = vld [vmem:[%s1889_s7 + $0x50] sm:$0xf] }
  0x21   :  { %473 = vmatmul.bf16.vlgmr.msra.gmra.mxu0 %v154_v38  ;;  %511 = vmatpush.bf16.msra.mxu3 %v1312_v41  ;;  %v1257_v21 = vor.u32 %v1352_v18, %v1256_v17  ;;  %v1220_v22 = vld [vmem:[%s1889_s7] sm:$0xf]  ;;  %v1354_v61 = vld [vmem:[%s1889_s7 + $0x68] sm:$0xf0] }
  0x22   :  { %517 = vmatpush.bf16.msrb.mxu0 %v1327_v34  ;;  %486 = vmatmul.bf16.vlgmr.msra.gmra.mxu1 %v155_v39  ;;  %v1221_v24 = vor.u32 %v1344_v23, %v1220_v22  ;;  %v1357_v25 = vld [vmem:[%s1884_s2] ss:$0 sm:$0xff]  ;;  %s978_s2 = sshll.u32 %s1891_s9, 4  ;;  %s979_s2 = int_to_ptr.hbm [resolvable:$true] %s978_s2 }
  0x23   :  { %530 = vmatpush.bf16.msrb.mxu1 %v1335_v35  ;;  %499 = vmatmul.bf16.vlgmr.msra.gmra.mxu2 %v156_v45 }
  0x24   :  { %550 = vmatpush.bf16.msrb.mxu2 %v1336_v42  ;;  %512 = vmatmul.bf16.vlgmr.msra.gmra.mxu3 %v157_v46  ;;  %v1341_v46 = vld [vmem:[%s1889_s7 + $0x4] sm:$0xf] }
  0x25   :  { %588 = vmatpush.bf16.msrb.mxu3 %v1338_v4  ;;  %v1238_v4 = vld [vmem:[%s1889_s7 + $0x2c] sm:$0xf0] }
  0x26   :  { %518 = vmatpush.bf16.msrb.mxu0 %v1326_v43  ;;  %v1349_v43 = vld [vmem:[%s1889_s7 + $0x44] sm:$0xf] }
  0x27   :  { %531 = vmatpush.bf16.msrb.mxu1 %v1334_v44  ;;  %v1258_v44 = vld [vmem:[%s1889_s7 + $0x5c] sm:$0xf0] }
  0x28   :  { %622 = vmatpush.bf16.msra.mxu2 %v1340_v3  ;;  %v1261_v45 = vor.u32 %v1349_v43, %v1258_v44 }
  0x29   :  { %589 = vmatpush.bf16.msrb.mxu3 %v1337_v8 }
  0x2a   :  { %519 = vmatpush.bf16.msrb.mxu0 %v1325_v47  ;;  %v1222_v47 = vld [vmem:[%s1889_s7 + $0x1c] sm:$0xf0] }
  0x2b   :  { %532 = vmatpush.bf16.msrb.mxu1 %v1333_v48  ;;  %v1228_v48 = vld [vmem:[%s1889_s7 + $0x8] sm:$0xf] }
  0x2c   :  { %623 = vmatpush.bf16.msra.mxu2 %v1339_v7 }
  0x2d   :  { %744 = vmatpush.bf16.msra.mxu3 %v1249_v15 }
  0x2e   :  { %520 = vmatpush.bf16.msrb.mxu0 %v1324_v49  ;;  %v1225_v49 = vor.u32 %v1341_v46, %v1222_v47 }
  0x2f   :  { %533 = vmatpush.bf16.msrb.mxu1 %v1332_v50  ;;  %v1345_v50 = vld [vmem:[%s1889_s7 + $0x20] sm:$0xf0] }
  0x31   :  { %745 = vmatpush.bf16.msra.mxu3 %v1221_v24 }
  0x32   :  { %521 = vmatpush.bf16.msrb.mxu0 %v1323_v52  ;;  %v1230_v52 = vld [vmem:[%s1889_s7 + $0x24] sm:$0xf0] }
  0x33   :  { %534 = vmatpush.bf16.msrb.mxu1 %v1331_v53  ;;  %1199 = vmatmul.msk.bf16.vlgmr.msrb.gmra.mxu2 %vm461_vm0, %v160_v57  ;;  %v1229_v53 = vor.u32 %v1345_v50, %v1228_v48  ;;  %v1233_v54 = vor.u32 %v1342_v51, %v1230_v52  ;;  %v1350_v57 = vld [vmem:[%s1889_s7 + $0x4c] sm:$0xf] }
  0x34   :  { %783 = vmatpush.bf16.msrb.mxu2 %v1261_v45 }
  0x36   :  { %522 = vmatpush.bf16.msrb.mxu0 %v1322_v55  ;;  %v1264_v55 = vld [vmem:[%s1889_s7 + $0x48] sm:$0xf] }
  0x37   :  { %535 = vmatpush.bf16.msrb.mxu1 %v1330_v56  ;;  %v1353_v56 = vld [vmem:[%s1889_s7 + $0x60] sm:$0xf0] }
  0x38   :  { %784 = vmatpush.bf16.msrb.mxu2 %v1233_v54 }
  0x3a   :  { %523 = vmatpush.bf16.msrb.mxu0 %v1321_v58  ;;  %v1265_v58 = vor.u32 %v1353_v56, %v1264_v55 }
  0x3b   :  { %536 = vmatpush.bf16.msrb.mxu1 %v1329_v59  ;;  %v1266_v59 = vld [vmem:[%s1889_s7 + $0x64] sm:$0xf0] }
  0x3c   :  { %v1269_v62 = vor.u32 %v1350_v57, %v1266_v59 }
  0x3e   :  { %524 = vmatpush.bf16.msrb.mxu0 %v1320_v63  ;;  %v1273_v63 = vor.u32 %v1354_v61, %v1272_v60 }
  0x3f   :  { %537 = vmatpush.bf16.msrb.mxu1 %v1328_v0  ;;  %v1236_v0 = vld [vmem:[%s1889_s7 + $0x10] sm:$0xf] }
  0x41   :  { %525 = vmatmul.bf16.vlgmr.msrb.gmra.mxu0 %v158_v1  ;;  %v1346_v1 = vld [vmem:[%s1889_s7 + $0x28] sm:$0xf0] }
  0x42   :  { %538 = vmatmul.bf16.vlgmr.msrb.gmra.mxu1 %v159_v2  ;;  %757 = vmatpush.bf16.msra.mxu0 %v1253_v20  ;;  %v1343_v2 = vld [vmem:[%s1889_s7 + $0x14] sm:$0xf]  ;;  %v1237_v3 = vor.u32 %v1346_v1, %v1236_v0 }
  0x43   :  { %770 = vmatpush.bf16.msra.mxu1 %v1257_v21  ;;  %v1241_v7 = vor.u32 %v1343_v2, %v1238_v4 }
  0x46   :  { %758 = vmatpush.bf16.msra.mxu0 %v1225_v49 }
  0x47   :  { %771 = vmatpush.bf16.msra.mxu1 %v1229_v53 }
  0x4a   :  { %809 = vmatpush.bf16.msrb.mxu0 %v1269_v62 }
  0x4b   :  { %822 = vmatpush.bf16.msrb.mxu1 %v1273_v63 }
  0x4e   :  { %810 = vmatpush.bf16.msrb.mxu0 %v1241_v7 }
  0x9e   :  { %v474_v5 = vpop.f32.mrf.mxu0 }
  0x9f   :  { %v487_v6 = vpop.f32.mrf.mxu1  ;;  %v475_v26 = vadd.f32 %v1357_v25, %v474_v5  ;;  %v1244_v5 = vld [vmem:[%s1889_s7 + $0x18] sm:$0xf] }
  0xa1   :  { %v488_v29 = vadd.f32 %v487_v6, %v475_v26  ;;  %v1347_v6 = vld [vmem:[%s1889_s7 + $0x30] sm:$0xf0] }
  0xa2   :  { %v1245_v8 = vor.u32 %v1347_v6, %v1244_v5 }
  0xa4   :  { %823 = vmatpush.bf16.msrb.mxu1 %v1245_v8 }
  0xa6   :  { %v476_v9 = vpop.f32.mrf.mxu0  ;;  %v500_v14 = vpop.f32.mrf.mxu2 }
  0xa7   :  { %v489_v10 = vpop.f32.mrf.mxu1  ;;  %v513_v19 = vpop.f32.mrf.mxu3  ;;  %v501_v30 = vadd.f32 %v500_v14, %v488_v29  ;;  %v1358_v9 = vld [vmem:[%s1886_s4] ss:$0 sm:$0xff]  ;;  %s1440_s4 = smov [#allocation4]  }
  0xa8   :  { %v1359_v10 = vld [vmem:[%s1888_s6] ss:$0 sm:$0xff]  ;;  %s987_s6 = sshll.u32 %s1440_s4, 4  ;;  %s988_s6 = int_to_ptr.vmem [resolvable:$true] %s987_s6 }
  0xa9   :  { %v514_v32 = vadd.f32 %v513_v19, %v501_v30  ;;  %v647_v19 = vld [vmem:[%s1890_s8] sm:$0x7f]  ;;  %s1441_s8 = smov [#allocation2]  }
  0xaa   :  { %v650_v20 = vperm.slane %v647_v19, 1  ;;  %v651_v21 = vperm.slane %v647_v19, 2  ;;  %v652_v29 = vperm.slane %v647_v19, 3  ;;  %v655_v44 = vperm.slane %v647_v19, 6  ;;  %s976_s10 = sshll.u32 %s1441_s8, 4  ;;  %s977_s10 = int_to_ptr.vmem [resolvable:$true] %s976_s10 }
  0xab   :  { %v653_v55 = vperm.slane %v647_v19, 4 }
  0xae   :  { %v502_v27 = vpop.f32.mrf.mxu2 }
  0xaf   :  { %v515_v28 = vpop.f32.mrf.mxu3  ;;  %v649_v27 = vperm.slane %v647_v19, 0 }
  0xb6   :  { %v552_v31 = vpop.f32.mrf.mxu2 }
  0xbe   :  { %v526_v33 = vpop.f32.mrf.mxu0  ;;  %v554_v37 = vpop.f32.mrf.mxu2 }
  0xbf   :  { %v539_v34 = vpop.f32.mrf.mxu1  ;;  %v527_v35 = vadd.f32 %v526_v33, %v514_v32 }
  0xc1   :  { %v540_v36 = vadd.f32 %v539_v34, %v527_v35 }
  0xc3   :  { %v553_v38 = vadd.f32 %v552_v31, %v540_v36 }
  0xc5   :  { %v556_v39 = vmax.f32 %v553_v38, 0.0 }
  0xc6   :  { %v528_v40 = vpop.f32.mrf.mxu0 }
  0xc7   :  { %v541_v41 = vpop.f32.mrf.mxu1  ;;  %v557_v42 = vpack.c.bf16 %v556_v39, %v556_v39 }
  0xc9   :  { %1208 = vmatmul.msk.bf16.vlgmr.msrb.gmra.mxu3 %vm578_vm1, %v557_v42  ;;  %1217 = vmatmul.msk.bf16.vlgmr.msra.gmra.mxu2 %vm578_vm1, %v557_v42  ;;  %v654_v42 = vperm.slane %v647_v19, 5 }
  0xca   :  { %796 = vmatpush.bf16.msrb.mxu3 %v1265_v58 }
  0xce   :  { %797 = vmatpush.bf16.msrb.mxu3 %v1237_v3 }
 0x14c   :  { %v591_v11 = vpop.f32.mrf.mxu3  ;;  %v625_v12 = vpop.f32.mrf.mxu2 }
 0x14d   :  { %v592_v13 = vadd.f32 %v1358_v9, %v591_v11  ;;  %v626_v14 = vadd.f32 %v1359_v10, %v625_v12 }
 0x14f   :  { %595 = vst [vmem:[#allocation4] sm:$0xff] %v592_v13  ;;  %v629_v15 = vmax.f32 %v626_v14, 0.0 }
 0x150   :  { %992 = dma.vmem_to_hbm [thread:$0]  %s988_s6, 128, %s990_s16, [#allocation5]  }
 0x151   :  { %v630_v16 = vpack.c.bf16 %v629_v15, %v629_v15 }
 0x153   :  { %1274 = vmatmul.msk.bf16.vlgmr.msra.gmra.mxu3 %vm578_vm1, %v630_v16  ;;  %1275 = vmatmul.msk.bf16.vlgmr.msra.gmra.mxu0 %vm578_vm1, %v630_v16 }
 0x154   :  { %1276 = vmatmul.msk.bf16.vlgmr.msra.gmra.mxu1 %vm578_vm1, %v630_v16  ;;  %1277 = vmatmul.msk.bf16.vlgmr.msrb.gmra.mxu2 %vm578_vm1, %v630_v16  ;;  %v593_v17 = vpop.f32.mrf.mxu3  ;;  %v627_v18 = vpop.f32.mrf.mxu2 }
 0x163   :  { %1278 = vmatmul.msk.bf16.vlgmr.msrb.gmra.mxu3 %vm578_vm1, %v630_v16  ;;  %1279 = vmatmul.msk.bf16.vlgmr.msrb.gmra.mxu0 %vm578_vm1, %v630_v16 }
 0x164   :  { %1280 = vmatmul.msk.bf16.vlgmr.msrb.gmra.mxu1 %vm578_vm1, %v630_v16 }
 0x1d0   :  { %v760_v22 = vpop.f32.mrf.mxu0 }
 0x1d1   :  { %v761_v23 = vadd.f32 %v760_v22, %v650_v20  ;;  %v773_v24 = vpop.f32.mrf.mxu1 }
 0x1d2   :  { %v774_v25 = vadd.f32 %v773_v24, %v651_v21 }
 0x1d3   :  { %v1282_v26 = vmul.f32 -1.442695, %v761_v23 }
 0x1d4   :  { %v1283_v28 = vmul.f32 -1.442695, %v774_v25 }
 0x1d5   :  { %1360 = vpow2.f32 %v1282_v26 }
 0x1d6   :  { %1362 = vpow2.f32 %v1283_v28  ;;  %v747_v30 = vpop.f32.mrf.mxu3 }
 0x1d7   :  { %v748_v31 = vadd.f32 %v747_v30, %v649_v27  ;;  %v786_v32 = vpop.f32.mrf.mxu2 }
 0x1d8   :  { %v787_v33 = vadd.f32 %v786_v32, %v652_v29  ;;  %v762_v34 = vpop.f32.mrf.mxu0 }
 0x1d9   :  { %v1281_v35 = vmul.f32 -1.442695, %v748_v31  ;;  %v775_v36 = vpop.f32.mrf.mxu1 }
 0x1da   :  { %v1284_v37 = vmul.f32 -1.442695, %v787_v33 }
 0x1db   :  { %v1361_v38 = vpop.eup %1360  ;;  %1364 = vpow2.f32 %v1281_v35 }
 0x1dc   :  { %v1363_v39 = vpop.eup %1362  ;;  %v1776_v40 = vadd.f32 1.0, %v1361_v38  ;;  %1366 = vpow2.f32 %v1284_v37 }
 0x1dd   :  { %v1778_v41 = vadd.f32 1.0, %v1363_v39 }
 0x1de   :  { %1368 = vrcp.f32 %v1776_v40  ;;  %v749_v43 = vpop.f32.mrf.mxu3  ;;  %v881_v62 = vand.u32 2147483647, %v1776_v40  ;;  %v883_v1 = vand.u32 2147483648, %v1776_v40  ;;  %vm877_vm2 = vweird.f32 %v1776_v40 }
 0x1df   :  { %1370 = vrcp.f32 %v1778_v41  ;;  %v788_v45 = vpop.f32.mrf.mxu2  ;;  %v896_v4 = vand.u32 2147483647, %v1778_v41  ;;  %vm892_vm3 = vweird.f32 %v1778_v41  ;;  %v898_v10 = vand.u32 2147483648, %v1778_v41 }
 0x1e0   :  { %v812_v46 = vpop.f32.mrf.mxu0  ;;  %vm1805_vm4 = vcmp.eq.f32.partialorder %v881_v62, 8.507059e+37  ;;  %v884_v14 = vor.u32 1.1754944e-38, %v883_v1 }
 0x1e1   :  { %v1365_v47 = vpop.eup %1364  ;;  %v813_v48 = vadd.f32 %v812_v46, %v654_v42  ;;  %v825_v49 = vpop.f32.mrf.mxu1  ;;  %vm1813_vm6 = vcmp.eq.f32.partialorder %v896_v4, 8.507059e+37  ;;  %v899_v33 = vor.u32 1.1754944e-38, %v898_v10 }
 0x1e2   :  { %v1367_v50 = vpop.eup %1366  ;;  %v1782_v51 = vadd.f32 1.0, %v1365_v47  ;;  %v826_v52 = vadd.f32 %v825_v49, %v655_v44 }
 0x1e3   :  { %v1784_v53 = vadd.f32 1.0, %v1367_v50  ;;  %v1286_v54 = vmul.f32 -1.442695, %v813_v48 }
 0x1e4   :  { %v1786_v56 = vpop.eup %1368  ;;  %1372 = vrcp.f32 %v1782_v51  ;;  %v1287_v57 = vmul.f32 -1.442695, %v826_v52  ;;  %v866_v17 = vand.u32 2147483647, %v1782_v51  ;;  %v868_v18 = vand.u32 2147483648, %v1782_v51 }
 0x1e5   :  { %v1789_v58 = vpop.eup %1370  ;;  %v873_v59 = vmul.f32 %v1786_v56, %v1776_v40  ;;  %1374 = vrcp.f32 %v1784_v53  ;;  %vm878_vm5 = vweird.f32 %v1786_v56  ;;  %v911_v28 = vand.u32 2147483647, %v1784_v53 }
 0x1e6   :  { %v888_v60 = vmul.f32 %v1789_v58, %v1778_v41  ;;  %1376 = vpow2.f32 %v1286_v54  ;;  %v799_v61 = vpop.f32.mrf.mxu3  ;;  %vm893_vm7 = vweird.f32 %v1789_v58  ;;  %v913_v30 = vand.u32 2147483648, %v1784_v53  ;;  %vm1832_vm9 = vmor %vm877_vm2, %vm878_vm5 }
 0x1e7   :  { %v874_v63 = vsub.f32 1.0, %v873_v59  ;;  %1378 = vpow2.f32 %v1287_v57  ;;  %v800_v0 = vadd.f32 %v799_v61, %v653_v55  ;;  %vm862_vm11 = vweird.f32 %v1782_v51  ;;  %vm1844_vm12 = vmor %vm892_vm3, %vm893_vm7 }
 0x1e8   :  { %v889_v2 = vsub.f32 1.0, %v888_v60  ;;  %v814_v3 = vpop.f32.mrf.mxu0  ;;  %v869_v36 = vor.u32 1.1754944e-38, %v868_v18  ;;  %vm907_vm14 = vweird.f32 %v1784_v53  ;;  %vm867_vm15 = vcmp.eq.f32.partialorder %v866_v17, 8.507059e+37 }
 0x1e9   :  { %v875_v5 = vmul.f32 %v1786_v56, %v874_v63  ;;  %v1285_v6 = vmul.f32 -1.442695, %v800_v0  ;;  %v827_v7 = vpop.f32.mrf.mxu1  ;;  %vm912_vm1 = vcmp.eq.f32.partialorder %v911_v28, 8.507059e+37  ;;  %v914_v44 = vor.u32 1.1754944e-38, %v913_v30 }
 0x1ea   :  { %v1373_v8 = vpop.eup %1372  ;;  %v890_v9 = vmul.f32 %v1789_v58, %v889_v2 }
 0x1eb   :  { %v1375_v11 = vpop.eup %1374  ;;  %v858_v12 = vmul.f32 %v1373_v8, %v1782_v51  ;;  %1380 = vpow2.f32 %v1285_v6  ;;  %v876_v23 = vadd.f32 %v1786_v56, %v875_v5  ;;  %vm863_vm8 = vweird.f32 %v1373_v8 }
 0x1ec   :  { %v1377_v15 = vpop.eup %1376  ;;  %v903_v16 = vmul.f32 %v1375_v11, %v1784_v53  ;;  %v891_v27 = vadd.f32 %v1789_v58, %v890_v9  ;;  %vm908_vm10 = vweird.f32 %v1375_v11  ;;  %vm864_vm13 = vmor %vm862_vm11, %vm863_vm8 }
 0x1ed   :  { %v1379_v20 = vpop.eup %1378  ;;  %v859_v21 = vsub.f32 1.0, %v858_v12  ;;  %v1817_v22 = vadd.f32 1.0, %v1377_v15  ;;  %v880_v37 = vsel %vm1832_vm9, %v1786_v56, %v876_v23  ;;  %vm909_vm0 = vmor %vm907_vm14, %vm908_vm10  ;;  %vm969_vm10 = vcmask 125952  }
 0x1ee   :  { %v904_v24 = vsub.f32 1.0, %v903_v16  ;;  %v1821_v25 = vadd.f32 1.0, %v1379_v20  ;;  %v801_v26 = vpop.f32.mrf.mxu3  ;;  %v895_v40 = vsel %vm1844_vm12, %v1789_v58, %v891_v27  ;;  %v885_v45 = vsel %vm1805_vm4, %v884_v14, %v880_v37 }
 0x1ef   :  { %v860_v29 = vmul.f32 %v1373_v8, %v859_v21  ;;  %1382 = vrcp.f32 %v1817_v22  ;;  %v900_v48 = vsel %vm1813_vm6, %v899_v33, %v895_v40  ;;  %vm937_vm4 = vweird.f32 %v1817_v22 }
 0x1f0   :  { %v905_v31 = vmul.f32 %v1375_v11, %v904_v24  ;;  %1384 = vrcp.f32 %v1821_v25  ;;  %v956_v59 = vand.u32 2147483647, %v1821_v25  ;;  %v958_v60 = vand.u32 2147483648, %v1821_v25 }
 0x1f1   :  { %v1381_v34 = vpop.eup %1380  ;;  %v861_v35 = vadd.f32 %v1373_v8, %v860_v29  ;;  %vm952_vm3 = vweird.f32 %v1821_v25  ;;  %v941_v63 = vand.u32 2147483647, %v1817_v22  ;;  %v943_v4 = vand.u32 2147483648, %v1817_v22 }
 0x1f2   :  { %v1848_v39 = vadd.f32 1.0, %v1381_v34  ;;  %v906_v42 = vadd.f32 %v1375_v11, %v905_v31  ;;  %vm957_vm7 = vcmp.eq.f32.partialorder %v956_v59, 8.507059e+37  ;;  %v959_v5 = vor.u32 1.1754944e-38, %v958_v60 }
 0x1f3   :  { %v865_v43 = vsel %vm864_vm13, %v1373_v8, %v861_v35  ;;  %v944_v15 = vor.u32 1.1754944e-38, %v943_v4  ;;  %vm942_vm14 = vcmp.eq.f32.partialorder %v941_v63, 8.507059e+37 }
 0x1f4   :  { %1386 = vrcp.f32 %v1848_v39  ;;  %v870_v41 = vsel %vm867_vm15, %v869_v36, %v865_v43  ;;  %v910_v46 = vsel %vm909_vm0, %v1375_v11, %v906_v42  ;;  %v928_v3 = vand.u32 2147483648, %v1848_v39 }
 0x1f5   :  { %v1383_v47 = vpop.eup %1382  ;;  %v915_v49 = vsel %vm912_vm1, %v914_v44, %v910_v46  ;;  %v962_v50 = vpack.c.bf16 %v885_v45, %v870_v41  ;;  %v926_v7 = vand.u32 2147483647, %v1848_v39  ;;  %vm922_vm11 = vweird.f32 %v1848_v39 }
 0x1f6   :  { %v1385_v51 = vpop.eup %1384  ;;  %v933_v52 = vmul.f32 %v1383_v47, %v1817_v22  ;;  %v963_v53 = vpack.c.bf16 %v915_v49, %v900_v48  ;;  %vm938_vm5 = vweird.f32 %v1383_v47  ;;  %v929_v14 = vor.u32 1.1754944e-38, %v928_v3 }
 0x1f7   :  { %v948_v54 = vmul.f32 %v1385_v51, %v1821_v25  ;;  %966 = vst [vmem:[#allocation2] sm:$0xff] %v962_v50  ;;  %vm953_vm2 = vweird.f32 %v1385_v51  ;;  %vm1872_vm9 = vmor %vm937_vm4, %vm938_vm5  ;;  %vm927_vm13 = vcmp.eq.f32.partialorder %v926_v7, 8.507059e+37 }
 0x1f8   :  { %v934_v55 = vsub.f32 1.0, %v933_v52  ;;  %967 = vst [vmem:[#allocation2 + $0x8] sm:$0xff] %v963_v53  ;;  %vm954_vm6 = vmor %vm952_vm3, %vm953_vm2 }
 0x1f9   :  { %v949_v56 = vsub.f32 1.0, %v948_v54 }
 0x1fa   :  { %v1387_v57 = vpop.eup %1386  ;;  %v935_v58 = vmul.f32 %v1383_v47, %v934_v55 }
 0x1fb   :  { %v950_v61 = vmul.f32 %v1385_v51, %v949_v56  ;;  %v918_v62 = vmul.f32 %v1387_v57, %v1848_v39  ;;  %vm923_vm8 = vweird.f32 %v1387_v57 }
 0x1fc   :  { %v936_v1 = vadd.f32 %v1383_v47, %v935_v58  ;;  %vm924_vm12 = vmor %vm922_vm11, %vm923_vm8 }
 0x1fd   :  { %v919_v0 = vsub.f32 1.0, %v918_v62  ;;  %v951_v2 = vadd.f32 %v1385_v51, %v950_v61 }
 0x1fe   :  { %v940_v12 = vsel %vm1872_vm9, %v1383_v47, %v936_v1 }
 0x1ff   :  { %v920_v6 = vmul.f32 %v1387_v57, %v919_v0  ;;  %v955_v8 = vsel %vm954_vm6, %v1385_v51, %v951_v2  ;;  %v945_v18 = vsel %vm942_vm14, %v944_v15, %v940_v12 }
 0x200   :  { %v960_v10 = vsel %vm957_vm7, %v959_v5, %v955_v8 }
 0x201   :  { %v921_v11 = vadd.f32 %v1387_v57, %v920_v6  ;;  %v965_v13 = vpack.c.bf16 %v960_v10, %v960_v10 }
 0x203   :  { %v925_v16 = vsel %vm924_vm12, %v1387_v57, %v921_v11  ;;  %970 = vst.msk [vmem:[#allocation2 + $0x18] sm:$0xf] %vm969_vm10, %v965_v13 }
 0x204   :  { %v930_v17 = vsel %vm927_vm13, %v929_v14, %v925_v16 }
 0x205   :  { %v964_v19 = vpack.c.bf16 %v945_v18, %v930_v17 }
 0x207   :  { %968 = vst [vmem:[#allocation2 + $0x10] sm:$0xff] %v964_v19 }
 0x208   :  { %981 = dma.vmem_to_hbm [thread:$0]  %s977_s10, 448, %s979_s2, [#allocation3]  }
 0x209   :  { %1436 = dma.done.wait [#allocation3], 448  }
 0x20a   :  { %1437 = vsyncadd [#allocation3], 4294966848 }
 0x20b   :  { %1438 = dma.done.wait [#allocation5], 128  }
 0x20c   :  { %1439 = vsyncadd [#allocation5], 4294967168 }
 0x20d   :  { %1001 = vsyncpa [#allocation3], 1 }
 0x20e   :  { %1002 = vsyncpa [#allocation5], 1 }

</bundles_post_ra>
